<compile_context>
chip_gen: v7x
topology: tpu7x:2x2x1
jax: 0.10.0
libtpu: 0.0.40
codegen_flags: <defaults>
</compile_context>

<pallas_src>
import functools

import jax
import jax.numpy as jnp
from jax import lax
from jax.experimental import pallas as pl
from jax.experimental.pallas import tpu as pltpu


def _round_up(x, m):
    return (x + m - 1) // m * m


def _pick_tile(dim, max_tile, gran):
    """Largest multiple of `gran` that divides `dim` and is <= max_tile (dim % gran == 0)."""
    best = gran
    t = gran
    limit = min(dim, max_tile)
    while t <= limit:
        if dim % t == 0:
            best = t
        t += gran
    return best


def _vmem_budget(tm, tk, tn, in_itemsize):
    # double-buffered inputs + double-buffered f32 output + f32 accumulator, 4x headroom,
    # clamped to the default scoped limit so it is safe on v5e / v6e / v7x.
    need = 2 * (tm * tk + tk * tn + tn) * in_itemsize + 2 * tm * tn * 4 + tm * tn * 4
    return int(min(max(4 * need, 8 * 1024 * 1024), 32 * 1024 * 1024))


def _proj_kernel(x_ref, w_ref, b_ref, o_ref, acc_ref):
    # x_ref: [tm, tk] bf16, w_ref: [tk, tn] bf16, b_ref: [1, tn] f32,
    # o_ref: [tm, tn] f32, acc_ref: [tm, tn] f32 scratch (resident across K steps).
    k = pl.program_id(2)

    @pl.when(k == 0)
    def _():
        acc_ref[...] = jnp.zeros_like(acc_ref)

    acc_ref[...] += jnp.dot(x_ref[...], w_ref[...],
                            preferred_element_type=jnp.float32)

    @pl.when(k == pl.num_programs(2) - 1)
    def _():
        # bias applied once per output tile, only on the last K step.
        o_ref[...] = (acc_ref[...] + b_ref[...]).astype(o_ref.dtype)


def _proj_matmul(x_patches, w_flat, bias):
    """x_patches: [M, K] bf16, w_flat: [K, E] bf16, bias: [E] f32 -> [M, E] f32."""
    M, K = x_patches.shape
    _, E = w_flat.shape

    # Lane/sublane-aligned, MXU-friendly padded dims (K, E multiples of 128; M of 8).
    M_pad = _round_up(M, 8)
    K_pad = _round_up(K, 128)
    E_pad = _round_up(E, 128)

    tm = _pick_tile(M_pad, 512, 8)      # sublane axis: multiple of 8
    tk = _pick_tile(K_pad, 1024, 128)   # contraction: 128-granular slabs
    tn = _pick_tile(E_pad, 256, 128)    # lane-dense output tile

    xp = jnp.pad(x_patches, ((0, M_pad - M), (0, K_pad - K)))
    wp = jnp.pad(w_flat, ((0, K_pad - K), (0, E_pad - E)))
    bp = jnp.pad(bias.astype(jnp.float32).reshape(1, E), ((0, 0), (0, E_pad - E)))

    grid = (M_pad // tm, E_pad // tn, K_pad // tk)

    cost = pl.CostEstimate(
        flops=2 * M_pad * K_pad * E_pad,
        transcendentals=0,
        bytes_accessed=(xp.size * xp.dtype.itemsize
                        + wp.size * wp.dtype.itemsize
                        + M_pad * E_pad * 4),
    )

    out = pl.pallas_call(
        _proj_kernel,
        out_shape=jax.ShapeDtypeStruct((M_pad, E_pad), jnp.float32),
        grid_spec=pltpu.PrefetchScalarGridSpec(
            num_scalar_prefetch=0,
            grid=grid,
            in_specs=[
                pl.BlockSpec((tm, tk), lambda i, j, k: (i, k)),
                pl.BlockSpec((tk, tn), lambda i, j, k: (k, j)),
                pl.BlockSpec((1, tn), lambda i, j, k: (0, j)),
            ],
            out_specs=pl.BlockSpec((tm, tn), lambda i, j, k: (i, j)),
            scratch_shapes=[pltpu.VMEM((tm, tn), jnp.float32)],
        ),
        compiler_params=pltpu.CompilerParams(
            dimension_semantics=("parallel", "parallel", "arbitrary"),
            vmem_limit_bytes=_vmem_budget(tm, tk, tn, xp.dtype.itemsize),
        ),
        cost_estimate=cost,
    )(xp, wp, bp)

    return out[:M, :E]


def patch_embed_forward(x, weight, bias, *, patch_size, compute_dtype=jnp.bfloat16):
    """x: [B, C, T, H, W]; weight: [E, C, 3, P, P]; bias: [E] -> [B, E, T', H', W'] (f32)."""
    B, C, T, H, W = x.shape
    E = weight.shape[0]
    P = patch_size
    kT, sT, padT = 3, 2, 1
    Tp = (T + 2 * padT - kT) // sT + 1
    Hp, Wp = H // P, W // P

    # Cast to bf16 BEFORE the im2col gather/transpose so the materialized patch buffer
    # (1.5x the input due to temporal overlap) is half the HBM bytes.
    xc = x.astype(compute_dtype)
    x_pad = jnp.pad(xc, ((0, 0), (0, 0), (padT, padT), (0, 0), (0, 0)))
    t_idx = sT * jnp.arange(Tp)[:, None] + jnp.arange(kT)[None, :]     # [T', 3]
    x_t = x_pad[:, :, t_idx, :, :]                                     # [B, C, T', 3, H, W]

    # non-overlapping spatial patches (glue)
    x_t = x_t.reshape(B, C, Tp, kT, Hp, P, Wp, P)
    x_t = x_t.transpose(0, 2, 4, 6, 1, 3, 5, 7)                        # [B,T',H',W',C,3,P,P]
    M = B * Tp * Hp * Wp
    K = C * kT * P * P
    x_patches = x_t.reshape(M, K)
    # TODO(synk): fold the kT=3 temporal-tap gather into the kernel (3 strided DMAs + K-axis
    # accumulation) so the duplicated im2col buffer is never written to HBM.

    w_flat = weight.reshape(E, K).T.astype(compute_dtype)              # [K, E]

    y = _proj_matmul(x_patches, w_flat, bias)                          # [M, E] f32

    # Module semantics require NCDHW output.
    y = y.reshape(B, Tp, Hp, Wp, E).transpose(0, 4, 1, 2, 3)           # [B, E, T', H', W']
    return y


def reference_forward(x, weight, bias, compute_dtype=jnp.bfloat16):
    # Reference conv on the same bf16-rounded inputs (accumulation in f32), so the
    # comparison isolates the kernel's correctness rather than bf16 input rounding.
    xr = x.astype(compute_dtype).astype(jnp.float32)
    wr = weight.astype(compute_dtype).astype(jnp.float32)
    y = lax.conv_general_dilated(
        xr, wr,
        window_strides=(2, weight.shape[3], weight.shape[4]),
        padding=((1, 1), (0, 0), (0, 0)),
        dimension_numbers=("NCDHW", "OIDHW", "NCDHW"))
    return y + bias.astype(jnp.float32).reshape(1, -1, 1, 1, 1)


if __name__ == "__main__":
    # Small, self-consistent shapes: img_size=16, patch_size=8, in_chans=3, embed_dim=32, T=8.
    B, C, T, H, W = 2, 3, 8, 16, 16
    P, E = 8, 32

    key = jax.random.PRNGKey(0)
    kx, kw, kb = jax.random.split(key, 3)
    x = jax.random.normal(kx, (B, C, T, H, W), dtype=jnp.float32)
    weight = 0.05 * jax.random.normal(kw, (E, C, 3, P, P), dtype=jnp.float32)
    bias = 0.01 * jax.random.normal(kb, (E,), dtype=jnp.float32)

    fwd = jax.jit(functools.partial(patch_embed_forward, patch_size=P))
    out = jax.block_until_ready(fwd(x, weight, bias))

    ref = jax.block_until_ready(reference_forward(x, weight, bias))
    assert out.shape == (B, E, 4, 2, 2), out.shape
    assert jnp.allclose(out, ref, rtol=2e-2, atol=2e-2), float(jnp.max(jnp.abs(out - ref)))

    print("KERNEL_OK")
</pallas_src>

<mosaic_0001>
module attributes {stable_mosaic.version = 11 : i64} {
  func.func @_proj_kernel(%arg0: i32, %arg1: i32, %arg2: i32, %arg3: memref<32x640xbf16, #tpu.memory_space<vmem>>, %arg4: memref<640x128xbf16, #tpu.memory_space<vmem>>, %arg5: memref<1x128xf32, #tpu.memory_space<vmem>>, %arg6: memref<32x128xf32, #tpu.memory_space<vmem>>, %arg7: memref<32x128xf32, #tpu.memory_space<vmem>>) attributes {dimension_semantics = [#tpu.dimension_semantics<parallel>, #tpu.dimension_semantics<parallel>, #tpu.dimension_semantics<arbitrary>], iteration_bounds = array<i64: 1, 1, 1>, scalar_prefetch = 0 : i64, scratch_operands = 1 : i64, tpu.core_type = #tpu.core_type<tc>, window_params = [{transform_indices = @transform_0, window_bounds = array<i64: 32, 640>}, {transform_indices = @transform_1, window_bounds = array<i64: 640, 128>}, {transform_indices = @transform_2, window_bounds = array<i64: 1, 128>}, {transform_indices = @transform_3, window_bounds = array<i64: 32, 128>}]} {
    %c0_i32 = arith.constant 0 : i32
    %0 = arith.cmpi eq, %arg2, %c0_i32 : i32
    %1 = arith.extui %0 : i1 to i32
    %c0_i32_0 = arith.constant 0 : i32
    %2 = arith.cmpi ne, %1, %c0_i32_0 : i32
    scf.if %2 {
      %cst_10 = arith.constant 0.000000e+00 : f32
      %12 = vector.broadcast %cst_10 : f32 to vector<32x128xf32>
      %c0_11 = arith.constant 0 : index
      %c0_12 = arith.constant 0 : index
      %13 = vector.load %arg7[%c0_11, %c0_12] : memref<32x128xf32, #tpu.memory_space<vmem>>, vector<32x128xf32>
      tpu.vector_store %arg7[%c0_11, %c0_12], %12 {strides = array<i32>} : memref<32x128xf32, #tpu.memory_space<vmem>>, vector<32x128xf32>,
    } else {
    }
    %c0 = arith.constant 0 : index
    %c0_1 = arith.constant 0 : index
    %3 = vector.load %arg7[%c0, %c0_1] : memref<32x128xf32, #tpu.memory_space<vmem>>, vector<32x128xf32>
    %c0_2 = arith.constant 0 : index
    %c0_3 = arith.constant 0 : index
    %4 = vector.load %arg3[%c0_2, %c0_3] : memref<32x640xbf16, #tpu.memory_space<vmem>>, vector<32x640xbf16>
    %c0_4 = arith.constant 0 : index
    %c0_5 = arith.constant 0 : index
    %5 = vector.load %arg4[%c0_4, %c0_5] : memref<640x128xbf16, #tpu.memory_space<vmem>>, vector<640x128xbf16>
    %cst = arith.constant dense<0.000000e+00> : vector<32x128xf32>
    %6 = tpu.matmul %4, %5, %cst {dimension_numbers = #tpu.dot_dimension_numbers<[1], [0], [0], [1], [0, 0, 1, 1], [], []>} : vector<32x640xbf16>, vector<640x128xbf16>, vector<32x128xf32> -> vector<32x128xf32>
    %7 = arith.addf %3, %6 : vector<32x128xf32>
    %c0_6 = arith.constant 0 : index
    %c0_7 = arith.constant 0 : index
    %8 = vector.load %arg7[%c0_6, %c0_7] : memref<32x128xf32, #tpu.memory_space<vmem>>, vector<32x128xf32>
    tpu.vector_store %arg7[%c0_6, %c0_7], %7 {strides = array<i32>} : memref<32x128xf32, #tpu.memory_space<vmem>>, vector<32x128xf32>,
    %c0_i32_8 = arith.constant 0 : i32
    %9 = arith.cmpi eq, %arg2, %c0_i32_8 : i32
    %10 = arith.extui %9 : i1 to i32
    %c0_i32_9 = arith.constant 0 : i32
    %11 = arith.cmpi ne, %10, %c0_i32_9 : i32
    scf.if %11 {
      %c0_10 = arith.constant 0 : index
      %c0_11 = arith.constant 0 : index
      %12 = vector.load %arg7[%c0_10, %c0_11] : memref<32x128xf32, #tpu.memory_space<vmem>>, vector<32x128xf32>
      %c0_12 = arith.constant 0 : index
      %c0_13 = arith.constant 0 : index
      %13 = vector.load %arg5[%c0_12, %c0_13] : memref<1x128xf32, #tpu.memory_space<vmem>>, vector<1x128xf32>
      %14 = vector.broadcast %13 : vector<1x128xf32> to vector<32x128xf32>
      %15 = arith.addf %12, %14 : vector<32x128xf32>
      %c0_14 = arith.constant 0 : index
      %c0_15 = arith.constant 0 : index
      %16 = vector.load %arg6[%c0_14, %c0_15] : memref<32x128xf32, #tpu.memory_space<vmem>>, vector<32x128xf32>
      tpu.vector_store %arg6[%c0_14, %c0_15], %15 {strides = array<i32>} : memref<32x128xf32, #tpu.memory_space<vmem>>, vector<32x128xf32>,
    } else {
    }
    return
  }
  func.func @transform_0(%arg0: i32, %arg1: i32, %arg2: i32) -> (i32, i32) {
    %c0_i32 = arith.constant 0 : i32
    return %arg0, %arg2 : i32, i32
  }
  func.func @transform_1(%arg0: i32, %arg1: i32, %arg2: i32) -> (i32, i32) {
    %c0_i32 = arith.constant 0 : i32
    return %arg2, %arg1 : i32, i32
  }
  func.func @transform_2(%arg0: i32, %arg1: i32, %arg2: i32) -> (i32, i32) {
    %c0_i32 = arith.constant 0 : i32
    %c0_i32_0 = arith.constant 0 : i32
    return %c0_i32, %arg1 : i32, i32
  }
  func.func @transform_3(%arg0: i32, %arg1: i32, %arg2: i32) -> (i32, i32) {
    %c0_i32 = arith.constant 0 : i32
    return %arg0, %arg1 : i32, i32
  }
}

</mosaic_0001>

<bundles_post_ra>
// kernel: patch_embed_forward.1
= control target key start
LH: loop header
LB: loop body
LE: loop exit
PB: predicated region body
PF: predicated region fallthrough
CT: control target
= control target key end

     0   :  { %s1011_s0 = inlined_call_operand.vmem [shape: bf16[32,640], index: 0, kind: input, shape index: {}]   ;;  %s1012_s1 = inlined_call_operand.vmem [shape: bf16[640,128], index: 1, kind: input, shape index: {}]   ;;  %s1013_s2 = inlined_call_operand.vmem [shape: f32[1,128], index: 2, kind: input, shape index: {}]   ;;  %s1014_s3 = inlined_call_operand.hbm [shape: f32[32,128], index: 3, kind: output, shape index: {}]  }
   0x1   :  { %v745_v0 = vld [vmem:[%s1012_s1 + $0x40] sm:$0xff]   ;;  %v749_v4 = vld [vmem:[%s1012_s1 + $0x48] sm:$0xff]   ;;  %v753_v8 = vld [vmem:[%s1012_s1 + $0x50] sm:$0xff]  }
   0x2   :  { %v746_v1 = vld [vmem:[%s1012_s1 + $0xc0] sm:$0xff]   ;;  %656 = vmatprep.subr.bf16.mxu0 %v745_v0  ;;  %v750_v5 = vld [vmem:[%s1012_s1 + $0xc8] sm:$0xff]   ;;  %v754_v9 = vld [vmem:[%s1012_s1 + $0xd0] sm:$0xff]  }
   0x3   :  { %v747_v2 = vld [vmem:[%s1012_s1] sm:$0xff]   ;;  %684 = vmatprep.subr.bf16.mxu1 %v746_v1  ;;  %v751_v6 = vld [vmem:[%s1012_s1 + $0x8] sm:$0xff]   ;;  %v755_v10 = vld [vmem:[%s1012_s1 + $0x10] sm:$0xff]  }
   0x4   :  { %v748_v3 = vld [vmem:[%s1012_s1 + $0x80] sm:$0xff]   ;;  %657 = vmatpush3.bf16.msra.mxu0 %v747_v2  ;;  %v752_v7 = vld [vmem:[%s1012_s1 + $0x88] sm:$0xff]   ;;  %v756_v11 = vld [vmem:[%s1012_s1 + $0x90] sm:$0xff]  }
   0x5   :  { %685 = vmatpush3.bf16.msra.mxu1 %v748_v3  ;;  %658 = vmatprep.subr.bf16.mxu0 %v749_v4  ;;  %v757_v12 = vld [vmem:[%s1012_s1 + $0x58] sm:$0xff]   ;;  %v761_v16 = vld [vmem:[%s1012_s1 + $0x60] sm:$0xff]   ;;  %v765_v20 = vld [vmem:[%s1012_s1 + $0x68] sm:$0xff]  }
   0x6   :  { %686 = vmatprep.subr.bf16.mxu1 %v750_v5  ;;  %v758_v13 = vld [vmem:[%s1012_s1 + $0xd8] sm:$0xff]   ;;  %v762_v17 = vld [vmem:[%s1012_s1 + $0xe0] sm:$0xff]   ;;  %v766_v21 = vld [vmem:[%s1012_s1 + $0xe8] sm:$0xff]  }
   0x7   :  { %v759_v14 = vld [vmem:[%s1012_s1 + $0x18] sm:$0xff]   ;;  %v763_v18 = vld [vmem:[%s1012_s1 + $0x20] sm:$0xff]   ;;  %v767_v22 = vld [vmem:[%s1012_s1 + $0x28] sm:$0xff]  }
   0x8   :  { %659 = vmatpush3.bf16.msra.mxu0 %v751_v6  ;;  %v760_v15 = vld [vmem:[%s1012_s1 + $0x98] sm:$0xff]   ;;  %v764_v19 = vld [vmem:[%s1012_s1 + $0xa0] sm:$0xff]   ;;  %v768_v23 = vld [vmem:[%s1012_s1 + $0xa8] sm:$0xff]  }
   0x9   :  { %687 = vmatpush3.bf16.msra.mxu1 %v752_v7  ;;  %660 = vmatprep.subr.bf16.mxu0 %v753_v8  ;;  %v769_v24 = vld [vmem:[%s1012_s1 + $0x70] sm:$0xff]   ;;  %v773_v28 = vld [vmem:[%s1012_s1 + $0x78] sm:$0xff]   ;;  %v782_v35 = vld [vmem:[%s1011_s0 + $0xc] ss:$20 sps:$4 sm:$0xff]  }
   0xa   :  { %688 = vmatprep.subr.bf16.mxu1 %v754_v9  ;;  %v770_v25 = vld [vmem:[%s1012_s1 + $0xf0] sm:$0xff]   ;;  %v774_v29 = vld [vmem:[%s1012_s1 + $0xf8] sm:$0xff]   ;;  %v783_v36 = vld [vmem:[%s1012_s1 + $0x100] sm:$0xff]   ;;  %493 = vmatprep.mubr.bf16.mxu1 %v782_v35 }
   0xb   :  { %v771_v26 = vld [vmem:[%s1012_s1 + $0x30] sm:$0xff]   ;;  %v775_v30 = vld [vmem:[%s1012_s1 + $0x38] sm:$0xff]   ;;  %v784_v37 = vld [vmem:[%s1012_s1 + $0x108] sm:$0xff]  }
   0xc   :  { %661 = vmatpush3.bf16.msra.mxu0 %v755_v10  ;;  %v772_v27 = vld [vmem:[%s1012_s1 + $0xb0] sm:$0xff]   ;;  %v776_v31 = vld [vmem:[%s1012_s1 + $0xb8] sm:$0xff]   ;;  %v788_v39 = vld [vmem:[%s1011_s0 + $0x2c] ss:$20 sps:$4 sm:$0xff]  }
   0xd   :  { %689 = vmatpush3.bf16.msra.mxu1 %v756_v11  ;;  %662 = vmatprep.subr.bf16.mxu0 %v757_v12  ;;  %v777_v32 = vld [vmem:[%s1011_s0] ss:$20 sps:$4 sm:$0xff]   ;;  %v779_v33 = vld [vmem:[%s1011_s0 + $0x4] ss:$20 sps:$4 sm:$0xff]   ;;  %v780_v34 = vld [vmem:[%s1011_s0 + $0x8] ss:$20 sps:$4 sm:$0xff]  }
   0xe   :  { %690 = vmatprep.subr.bf16.mxu1 %v758_v13  ;;  %444 = vmatprep.mubr.bf16.mxu0 %v779_v33  ;;  %v785_v38 = vld [vmem:[%s1012_s1 + $0x110] sm:$0xff]   ;;  %v786_v41 = vld [vmem:[%s1012_s1 + $0x118] sm:$0xff]   ;;  %v787_v45 = vld [vmem:[%s1012_s1 + $0x120] sm:$0xff]  }
   0xf   :  { %v790_v40 = vld [vmem:[%s1011_s0 + $0x34] ss:$20 sps:$4 sm:$0xff]   ;;  %v794_v43 = vld [vmem:[%s1011_s0 + $0x30] ss:$20 sps:$4 sm:$0xff]  }
  0x10   :  { %663 = vmatpush3.bf16.msra.mxu0 %v759_v14  ;;  %v793_v42 = vld [vmem:[%s1011_s0 + $0x28] ss:$20 sps:$4 sm:$0xff]   ;;  %v797_v44 = vld [vmem:[%s1011_s0 + $0x10] ss:$20 sps:$4 sm:$0xff]  }
  0x11   :  { %691 = vmatpush3.bf16.msra.mxu1 %v760_v15  ;;  %664 = vmatprep.subr.bf16.mxu0 %v761_v16 }
  0x12   :  { %692 = vmatprep.subr.bf16.mxu1 %v762_v17 }
  0x14   :  { %665 = vmatpush3.bf16.msra.mxu0 %v763_v18 }
  0x15   :  { %693 = vmatpush3.bf16.msra.mxu1 %v764_v19  ;;  %666 = vmatprep.subr.bf16.mxu0 %v765_v20 }
  0x16   :  { %694 = vmatprep.subr.bf16.mxu1 %v766_v21 }
  0x18   :  { %667 = vmatpush3.bf16.msra.mxu0 %v767_v22 }
  0x19   :  { %695 = vmatpush3.bf16.msra.mxu1 %v768_v23  ;;  %668 = vmatprep.subr.bf16.mxu0 %v769_v24 }
  0x1a   :  { %696 = vmatprep.subr.bf16.mxu1 %v770_v25 }
  0x1c   :  { %669 = vmatpush3.bf16.msra.mxu0 %v771_v26 }
  0x1d   :  { %697 = vmatpush3.bf16.msra.mxu1 %v772_v27  ;;  %670 = vmatprep.subr.bf16.mxu0 %v773_v28 }
  0x1e   :  { %698 = vmatprep.subr.bf16.mxu1 %v774_v29 }
  0x20   :  { %671 = vmatpush3.bf16.msra.mxu0 %v775_v30 }
  0x21   :  { %699 = vmatpush3.bf16.msra.mxu1 %v776_v31  ;;  %722 = vmatprep.subr.bf16.mxu0 %v783_v36 }
  0x23   :  { %445 = vmatmul.mubr.bf16.vlgmr.msra.gmra.mrb[0].mxu0 %v777_v32 }
  0x24   :  { %494 = vmatmul.mubr.bf16.vlgmr.msra.gmra.mrb[0].mxu1 %v780_v34  ;;  %723 = vmatpush3.bf16.msra.mxu0 %v783_v36 }
  0x25   :  { %724 = vmatprep.subr.bf16.mxu0 %v784_v37  ;;  %452 = vmatprep.mubr.bf16.mxu0 %v788_v39 }
  0x26   :  { %501 = vmatprep.mubr.bf16.mxu1 %v790_v40 }
  0x28   :  { %725 = vmatpush3.bf16.msra.mxu0 %v784_v37 }
  0x29   :  { %726 = vmatprep.subr.bf16.mxu0 %v785_v38 }
  0x2b   :  { %453 = vmatmul.mubr.bf16.gmra.mrb[4].mxu0 %v793_v42 }
  0x2c   :  { %502 = vmatmul.mubr.bf16.gmra.mrb[4].mxu1 %v794_v43  ;;  %727 = vmatpush3.bf16.msra.mxu0 %v785_v38 }
  0x2d   :  { %728 = vmatprep.subr.bf16.mxu0 %v786_v41 }
  0x2e   :  { %8 = vsyncpa [#allocation4], 0  ;;  %738 = vmatprep.mubr.bf16.mxu0 %v797_v44  ;;  %v792_v46 = vld [vmem:[%s1012_s1 + $0x128] sm:$0xff]   ;;  %v795_v47 = vld [vmem:[%s1012_s1 + $0x130] sm:$0xff]   ;;  %s823_s4 = smov [#allocation3]  }
  0x2f   :  { %v796_v48 = vld [vmem:[%s1012_s1 + $0x138] sm:$0xff]   ;;  %v655_v15 = vld [vmem:[%s1013_s2] ss:$0 sm:$0xff]  ;;  %s594_s5 = sshll.u32 %s823_s4, 4  ;;  %s595_s5 = int_to_ptr.vmem [resolvable:$true] %s594_s5 }
  0x30   :  { %729 = vmatpush3.bf16.msra.mxu0 %v786_v41  ;;  %v798_v49 = vld [vmem:[%s1011_s0 + $0x38] ss:$20 sps:$4 sm:$0xff]   ;;  %s799_s6 = scalar_lea.vmem %s595_s5, 512  ;;  %p804_p1 = scmp.lt.s32.totalorder %s595_s5, %s595_s5 }
  0x31   :  { %730 = vmatprep.subr.bf16.mxu0 %v787_v45  ;;  %p800_p0 = scmp.ne.s32.totalorder %s595_s5, %s799_s6  ;;  %p805_p2 = scmp.lt.s32.totalorder %s799_s6, %s799_s6 }
  0x33   :  { %p806_p3 = por %p805_p2, %p804_p1 }
  0x34   :  { %731 = vmatpush3.bf16.msra.mxu0 %v787_v45 }
  0x35   :  { %732 = vmatprep.subr.bf16.mxu0 %v792_v46  ;;  %p807_p4 = pnand %p806_p3, %p800_p0 }
  0x38   :  { %733 = vmatpush3.bf16.msra.mxu0 %v792_v46 }
  0x39   :  { %734 = vmatprep.subr.bf16.mxu0 %v795_v47 }
  0x3c   :  { %735 = vmatpush3.bf16.msra.mxu0 %v795_v47 }
  0x3d   :  { %736 = vmatprep.subr.bf16.mxu0 %v796_v48 }
  0x40   :  { %737 = vmatpush3.bf16.msra.mxu0 %v796_v48 }
  0x43   :  { %739 = vmatmul.mubr.bf16.vlgmr.msra.gmra.mrb[8].mxu0 %v798_v49 }
  0xf6   :  { %v672_v50 = vpop.f32.mrb[0].mxu0 }
  0xf7   :  { %v700_v51 = vpop.f32.mrb[0].mxu1  ;;  %v673_v52 = vpop.f32.mrb[1].mxu0 }
  0xf8   :  { %v674_v53 = vadd.f32 %v673_v52, %v672_v50  ;;  %v701_v54 = vpop.f32.mrb[1].mxu1  ;;  %v675_v55 = vpop.f32.mrb[2].mxu0 }
  0xf9   :  { %v702_v56 = vadd.f32 %v701_v54, %v700_v51  ;;  %v703_v57 = vpop.f32.mrb[2].mxu1  ;;  %v676_v58 = vpop.f32.mrb[3].mxu0 }
  0xfa   :  { %v677_v59 = vadd.f32 %v676_v58, %v675_v55  ;;  %v704_v60 = vpop.f32.mrb[3].mxu1 }
  0xfb   :  { %v705_v61 = vadd.f32 %v704_v60, %v703_v57  ;;  %v496_v62 = vadd.f32 %v702_v56, %v674_v53 }
  0xfd   :  { %v499_v63 = vadd.f32 %v705_v61, %v677_v59 }
  0xfe   :  { %v678_v0 = vpop.f32.mrb[4].mxu0 }
  0xff   :  { %v706_v1 = vpop.f32.mrb[4].mxu1  ;;  %v679_v2 = vpop.f32.mrb[5].mxu0 }
 0x100   :  { %v680_v3 = vadd.f32 %v679_v2, %v678_v0  ;;  %v707_v4 = vpop.f32.mrb[5].mxu1  ;;  %v681_v5 = vpop.f32.mrb[6].mxu0 }
 0x101   :  { %v708_v6 = vadd.f32 %v707_v4, %v706_v1  ;;  %v709_v7 = vpop.f32.mrb[6].mxu1  ;;  %v682_v8 = vpop.f32.mrb[7].mxu0 }
 0x102   :  { %v683_v9 = vadd.f32 %v682_v8, %v681_v5  ;;  %v710_v10 = vpop.f32.mrb[7].mxu1 }
 0x103   :  { %v711_v11 = vadd.f32 %v710_v10, %v709_v7  ;;  %v504_v12 = vadd.f32 %v708_v6, %v680_v3 }
 0x105   :  { %v507_v13 = vadd.f32 %v711_v11, %v683_v9 }
 0x116   :  { %v740_v14 = vpop.f32.mrb[8].mxu0 }
 0x117   :  { %v553_v16 = vadd.f32 %v740_v14, %v504_v12  ;;  %v544_v17 = vpop.f32.mrb[9].mxu0 }
 0x118   :  { %v545_v18 = vadd.f32 %v544_v17, %v496_v62  ;;  %v741_v19 = vpop.f32.mrb[10].mxu0 }
 0x119   :  { %v583_v20 = vadd.f32 %v655_v15, %v553_v16  ;;  %v556_v21 = vadd.f32 %v741_v19, %v507_v13  ;;  %v547_v22 = vpop.f32.mrb[11].mxu0 }
 0x11a   :  { %v581_v23 = vadd.f32 %v655_v15, %v545_v18  ;;  %v548_v24 = vadd.f32 %v547_v22, %v499_v63 }
 0x11b   :  { %587 = vst [vmem:[#allocation3 + $0x10] sm:$0xff] %v583_v20  ;;  %v584_v25 = vadd.f32 %v655_v15, %v556_v21 }
 0x11c   :  { %585 = vst [vmem:[#allocation3] sm:$0xff] %v581_v23  ;;  %v582_v26 = vadd.f32 %v655_v15, %v548_v24 }
 0x11d   :  { %588 = vst [vmem:[#allocation3 + $0x18] sm:$0xff] %v584_v25 }
 0x11e   :  { %586 = vst [vmem:[#allocation3 + $0x8] sm:$0xff] %v582_v26 }
 0x11f   :  { %810 = shalt.err (!%p807_p4)
}
 0x120   :  { %s811_s8 = scalar_lea.hbm %s1014_s3, 512 }
 0x121   :  { %p812_p5 = scmp.ne.s32.totalorder %s1014_s3, %s811_s8  ;;  %p815_p6 = scmp.lt.u32.totalorder %s811_s8, %s1014_s3 }
 0x123   :  { %p817_p7 = pnand %p815_p6, %p812_p5 }
 0x125   :  { %820 = shalt.err (!%p817_p7)
}
 0x126   :  { %s824_s13 = smov 128   ;;  %s825_s14 = smov 8  }
 0x127   :  { %600 = dma.vmem_to_hbm [thread:$0]  %s595_s5, 512, %s1014_s3, [#allocation4], %s824_s13, %s824_s13, %s825_s14  }
 0x128   :  { %821 = dma.done.wait [#allocation4], 512  }
 0x129   :  { %822 = vsyncadd [#allocation4], 4294966784 }
 0x12a   :  { %604 = vsyncpa [#allocation4], 1 }

</bundles_post_ra>
